<compile_context>
chip_gen: v7x
topology: tpu7x:2x2x1
jax: 0.10.0
libtpu: 0.0.40
codegen_flags: <defaults>
</compile_context>

<pallas_src>
from functools import partial

import jax
import jax.numpy as jnp
from jax.experimental import pallas as pl
from jax.experimental.pallas import tpu as pltpu

_LANE = 128
_BF16_SUBLANE = 16  # bf16 vreg is (16, 128)


def _round_up(n, m):
    return ((n + m - 1) // m) * m


# ---------------------------------------------------------------------------
# Pallas kernel: fused  x @ W1 + b1 -> GELU -> h @ W2 + b2
#   x_ref : (tm, D_in) f32     w1_ref: (D_in, Hp) bf16    b1_ref: (1, Hp) f32
#   w2_ref: (Hp, V)    bf16    b2_ref: (1, V)     f32     o_ref : (tm, V) f32
# ---------------------------------------------------------------------------
def _mlp_kernel(x_ref, w1_ref, b1_ref, w2_ref, b2_ref, o_ref):
    x = x_ref[...].astype(jnp.bfloat16)                      # in-kernel cast (cheap VPU)
    h = jnp.dot(x, w1_ref[...], preferred_element_type=jnp.float32)
    h = h + b1_ref[...]
    # tanh-form GELU -> EUP slot; elementwise math stays f32 (v5e safe).
    h = jax.nn.gelu(h, approximate=True)
    y = jnp.dot(h.astype(jnp.bfloat16), w2_ref[...],
                preferred_element_type=jnp.float32)
    y = y + b2_ref[...]
    o_ref[...] = y.astype(o_ref.dtype)


def mlp_forward(x, w1p, b1p, w2p, b2p, *, tm_max=512):
    """x: (T, D_in) f32 ; w1p/b1p/w2p/b2p are the pre-padded params.

    Streams 16-aligned token tiles over a 1-D "parallel" grid; the (tiny)
    padded weights are full blocks (index_map -> (0, 0)) and stay VMEM-resident.
    """
    T, D_in = x.shape
    Hp = w1p.shape[1]
    V = w2p.shape[1]

    # 16-sublane-aligned token tile; aim for >= 2 tiles so v7x megacore is used.
    T16 = _round_up(max(T, 1), _BF16_SUBLANE)
    tm = min(tm_max, max(_BF16_SUBLANE,
                         _round_up(pl.cdiv(T16, 2), _BF16_SUBLANE)))
    grid = (pl.cdiv(T, tm),)   # ragged last tile: OOB reads unused rows, OOB writes dropped

    cost = pl.CostEstimate(
        flops=2 * T * D_in * Hp + 2 * T * Hp * V,
        transcendentals=T * Hp,
        bytes_accessed=(T * D_in * 4 + w1p.size * 2 + b1p.size * 4
                        + w2p.size * 2 + b2p.size * 4 + T * V * 4),
    )

    return pl.pallas_call(
        _mlp_kernel,
        out_shape=jax.ShapeDtypeStruct((T, V), jnp.float32),
        grid_spec=pltpu.PrefetchScalarGridSpec(
            num_scalar_prefetch=0,
            grid=grid,
            in_specs=[
                pl.BlockSpec((tm, D_in), lambda i: (i, 0)),   # streamed activations (f32)
                pl.BlockSpec((D_in, Hp), lambda i: (0, 0)),   # weights: VMEM-resident
                pl.BlockSpec((1, Hp), lambda i: (0, 0)),
                pl.BlockSpec((Hp, V), lambda i: (0, 0)),
                pl.BlockSpec((1, V), lambda i: (0, 0)),
            ],
            out_specs=pl.BlockSpec((tm, V), lambda i: (i, 0)),
        ),
        compiler_params=pltpu.CompilerParams(
            dimension_semantics=("parallel",),   # token axis shards across TCs on v7x
        ),
        cost_estimate=cost,
    )(x, w1p, b1p, w2p, b2p)


@jax.jit
def _net_forward(x, w1p, b1p, w2p, b2p):
    """(B, S, D) -> (B, S, V); reshape + kernel fused under one jit."""
    B, S, D = x.shape
    y = mlp_forward(x.reshape(B * S, D), w1p, b1p, w2p, b2p)
    return y.reshape(B, S, -1)


# ---------------------------------------------------------------------------
# Inner net (the thing DDP wraps) and the DDP wrapper itself
# ---------------------------------------------------------------------------
class TinyAutoregressiveHead:
    """Minimal stand-in net: Linear(D, H) -> GELU -> Linear(H, V)."""

    def __init__(self, key, d_model=32, d_hidden=64, vocab=32):
        k1, k2, k3, k4 = jax.random.split(key, 4)
        self.w1 = (jax.random.normal(k1, (d_model, d_hidden), jnp.float32)
                   * (1.0 / jnp.sqrt(d_model)))
        self.b1 = jax.random.normal(k2, (1, d_hidden), jnp.float32) * 0.01
        self.w2 = (jax.random.normal(k3, (d_hidden, vocab), jnp.float32)
                   * (1.0 / jnp.sqrt(d_hidden)))
        self.b2 = jax.random.normal(k4, (1, vocab), jnp.float32) * 0.01

        # Precompute padded / cast params ONCE (review item #2).
        # Hidden dim padded to 128 lanes; extra rows/cols are zero so
        # gelu(0 + 0) = 0 and contribute nothing through W2.
        Hp = _round_up(d_hidden, _LANE)
        self.w1p = (jnp.zeros((d_model, Hp), jnp.bfloat16)
                    .at[:, :d_hidden].set(self.w1.astype(jnp.bfloat16)))
        self.b1p = (jnp.zeros((1, Hp), jnp.float32)
                    .at[:, :d_hidden].set(self.b1))
        self.w2p = (jnp.zeros((Hp, vocab), jnp.bfloat16)
                    .at[:d_hidden, :].set(self.w2.astype(jnp.bfloat16)))
        self.b2p = self.b2.astype(jnp.float32)

    def __call__(self, x):
        # x: (batch, seq, d_model) -> logits (batch, seq, vocab)
        return _net_forward(x, self.w1p, self.b1p, self.w2p, self.b2p)


class DDP:
    """Exact forward semantics of the PyTorch DDP module: forward(*args) = net(*args)."""
    # TODO(synk): DDP's gradient bucketing / all-reduce has no forward-pass
    # equivalent; forward is a pure pass-through and is implemented as such.

    def __init__(self, net):
        self.net = net

    def __call__(self, *args):
        return self.net(*args)


# ---------------------------------------------------------------------------
if __name__ == "__main__":
    key = jax.random.PRNGKey(0)
    k_net, k_x = jax.random.split(key)

    batch, seq, d_model, d_hidden, vocab = 2, 8, 32, 64, 32
    net = TinyAutoregressiveHead(k_net, d_model=d_model, d_hidden=d_hidden, vocab=vocab)
    ddp = DDP(net)

    x = jax.random.normal(k_x, (batch, seq, d_model), jnp.float32)

    out = ddp(x)
    out = jax.block_until_ready(out)
    assert out.shape == (batch, seq, vocab)

    # Reference emulating the kernel's bf16-operand / f32-accumulate path.
    xb = x.reshape(-1, d_model).astype(jnp.bfloat16).astype(jnp.float32)
    w1b = net.w1.astype(jnp.bfloat16).astype(jnp.float32)
    w2b = net.w2.astype(jnp.bfloat16).astype(jnp.float32)
    ref_h = jax.nn.gelu(xb @ w1b + net.b1, approximate=True)
    ref = (ref_h.astype(jnp.bfloat16).astype(jnp.float32) @ w2b + net.b2)
    ref = ref.reshape(batch, seq, vocab)
    assert jnp.allclose(out, ref, atol=5e-3, rtol=5e-3), (
        float(jnp.max(jnp.abs(out - ref))))

    print("KERNEL_OK")
</pallas_src>

<mosaic_0001>
module attributes {stable_mosaic.version = 11 : i64} {
  func.func @_mlp_kernel(%arg0: i32, %arg1: memref<16x32xf32, #tpu.memory_space<vmem>>, %arg2: memref<32x128xbf16, #tpu.memory_space<vmem>>, %arg3: memref<1x128xf32, #tpu.memory_space<vmem>>, %arg4: memref<128x32xbf16, #tpu.memory_space<vmem>>, %arg5: memref<1x32xf32, #tpu.memory_space<vmem>>, %arg6: memref<16x32xf32, #tpu.memory_space<vmem>>) attributes {dimension_semantics = [#tpu.dimension_semantics<parallel>], iteration_bounds = array<i64: 1>, scalar_prefetch = 0 : i64, scratch_operands = 0 : i64, tpu.core_type = #tpu.core_type<tc>, window_params = [{transform_indices = @transform_0, window_bounds = array<i64: 16, 32>}, {pipeline_mode = #tpu.pipeline_mode<synchronous>, transform_indices = @transform_1, window_bounds = array<i64: 32, 128>}, {pipeline_mode = #tpu.pipeline_mode<synchronous>, transform_indices = @transform_2, window_bounds = array<i64: 1, 128>}, {pipeline_mode = #tpu.pipeline_mode<synchronous>, transform_indices = @transform_3, window_bounds = array<i64: 128, 32>}, {pipeline_mode = #tpu.pipeline_mode<synchronous>, transform_indices = @transform_4, window_bounds = array<i64: 1, 32>}, {transform_indices = @transform_5, window_bounds = array<i64: 16, 32>}]} {
    %c0 = arith.constant 0 : index
    %c0_0 = arith.constant 0 : index
    %0 = vector.load %arg1[%c0, %c0_0] : memref<16x32xf32, #tpu.memory_space<vmem>>, vector<16x32xf32>
    %1 = arith.truncf %0 : vector<16x32xf32> to vector<16x32xbf16>
    %c0_1 = arith.constant 0 : index
    %c0_2 = arith.constant 0 : index
    %2 = vector.load %arg2[%c0_1, %c0_2] : memref<32x128xbf16, #tpu.memory_space<vmem>>, vector<32x128xbf16>
    %cst = arith.constant dense<0.000000e+00> : vector<16x128xf32>
    %3 = tpu.matmul %1, %2, %cst {dimension_numbers = #tpu.dot_dimension_numbers<[1], [0], [0], [1], [0, 0, 1, 1], [], []>} : vector<16x32xbf16>, vector<32x128xbf16>, vector<16x128xf32> -> vector<16x128xf32>
    %c0_3 = arith.constant 0 : index
    %c0_4 = arith.constant 0 : index
    %4 = vector.load %arg3[%c0_3, %c0_4] : memref<1x128xf32, #tpu.memory_space<vmem>>, vector<1x128xf32>
    %5 = vector.broadcast %4 : vector<1x128xf32> to vector<16x128xf32>
    %6 = arith.addf %3, %5 : vector<16x128xf32>
    %7 = arith.mulf %6, %6 : vector<16x128xf32>
    %8 = arith.mulf %6, %7 : vector<16x128xf32>
    %cst_5 = arith.constant 4.471500e-02 : f32
    %9 = vector.broadcast %cst_5 : f32 to vector<16x128xf32>
    %10 = arith.mulf %9, %8 : vector<16x128xf32>
    %11 = arith.addf %6, %10 : vector<16x128xf32>
    %cst_6 = arith.constant 0.797884583 : f32
    %12 = vector.broadcast %cst_6 : f32 to vector<16x128xf32>
    %13 = arith.mulf %12, %11 : vector<16x128xf32>
    %14 = math.tanh %13 : vector<16x128xf32>
    %cst_7 = arith.constant 1.000000e+00 : f32
    %15 = vector.broadcast %cst_7 : f32 to vector<16x128xf32>
    %16 = arith.addf %15, %14 : vector<16x128xf32>
    %cst_8 = arith.constant 5.000000e-01 : f32
    %17 = vector.broadcast %cst_8 : f32 to vector<16x128xf32>
    %18 = arith.mulf %17, %16 : vector<16x128xf32>
    %19 = arith.mulf %6, %18 : vector<16x128xf32>
    %20 = arith.truncf %19 : vector<16x128xf32> to vector<16x128xbf16>
    %c0_9 = arith.constant 0 : index
    %c0_10 = arith.constant 0 : index
    %21 = vector.load %arg4[%c0_9, %c0_10] : memref<128x32xbf16, #tpu.memory_space<vmem>>, vector<128x32xbf16>
    %cst_11 = arith.constant dense<0.000000e+00> : vector<16x32xf32>
    %22 = tpu.matmul %20, %21, %cst_11 {dimension_numbers = #tpu.dot_dimension_numbers<[1], [0], [0], [1], [0, 0, 1, 1], [], []>} : vector<16x128xbf16>, vector<128x32xbf16>, vector<16x32xf32> -> vector<16x32xf32>
    %c0_12 = arith.constant 0 : index
    %c0_13 = arith.constant 0 : index
    %23 = vector.load %arg5[%c0_12, %c0_13] : memref<1x32xf32, #tpu.memory_space<vmem>>, vector<1x32xf32>
    %24 = vector.broadcast %23 : vector<1x32xf32> to vector<16x32xf32>
    %25 = arith.addf %22, %24 : vector<16x32xf32>
    %c0_14 = arith.constant 0 : index
    %c0_15 = arith.constant 0 : index
    %26 = vector.load %arg6[%c0_14, %c0_15] : memref<16x32xf32, #tpu.memory_space<vmem>>, vector<16x32xf32>
    tpu.vector_store %arg6[%c0_14, %c0_15], %25 {strides = array<i32>} : memref<16x32xf32, #tpu.memory_space<vmem>>, vector<16x32xf32>,
    return
  }
  func.func @transform_0(%arg0: i32) -> (i32, i32) {
    %c0_i32 = arith.constant 0 : i32
    %c0_i32_0 = arith.constant 0 : i32
    return %arg0, %c0_i32 : i32, i32
  }
  func.func @transform_1(%arg0: i32) -> (i32, i32) {
    %c0_i32 = arith.constant 0 : i32
    %c0_i32_0 = arith.constant 0 : i32
    %c0_i32_1 = arith.constant 0 : i32
    return %c0_i32, %c0_i32_0 : i32, i32
  }
  func.func @transform_2(%arg0: i32) -> (i32, i32) {
    %c0_i32 = arith.constant 0 : i32
    %c0_i32_0 = arith.constant 0 : i32
    %c0_i32_1 = arith.constant 0 : i32
    return %c0_i32, %c0_i32_0 : i32, i32
  }
  func.func @transform_3(%arg0: i32) -> (i32, i32) {
    %c0_i32 = arith.constant 0 : i32
    %c0_i32_0 = arith.constant 0 : i32
    %c0_i32_1 = arith.constant 0 : i32
    return %c0_i32, %c0_i32_0 : i32, i32
  }
  func.func @transform_4(%arg0: i32) -> (i32, i32) {
    %c0_i32 = arith.constant 0 : i32
    %c0_i32_0 = arith.constant 0 : i32
    %c0_i32_1 = arith.constant 0 : i32
    return %c0_i32, %c0_i32_0 : i32, i32
  }
  func.func @transform_5(%arg0: i32) -> (i32, i32) {
    %c0_i32 = arith.constant 0 : i32
    %c0_i32_0 = arith.constant 0 : i32
    return %arg0, %c0_i32 : i32, i32
  }
}

</mosaic_0001>

<bundles_post_ra>
// kernel: _net_forward.1
= control target key start
LH: loop header
LB: loop body
LE: loop exit
PB: predicated region body
PF: predicated region fallthrough
CT: control target
= control target key end

     0   :  { %v338_v1 = vmov 0.0   ;;  %vm339_vm0 = vmmov 0   ;;  %vm48_vm1 = vcmask 261120   ;;  %s430_s0 = inlined_call_operand.vmem [shape: f32[16,32], index: 0, kind: input, shape index: {}]   ;;  %s431_s1 = inlined_call_operand.vmem [shape: bf16[32,128], index: 1, kind: input, shape index: {}]   ;;  %s432_s2 = inlined_call_operand.vmem [shape: f32[1,128], index: 2, kind: input, shape index: {}]   ;;  %s433_s3 = inlined_call_operand.vmem [shape: bf16[128,32], index: 3, kind: input, shape index: {}]   ;;  %s434_s4 = inlined_call_operand.vmem [shape: f32[1,32], index: 4, kind: input, shape index: {}]   ;;  %s435_s5 = inlined_call_operand.hbm [shape: f32[16,32], index: 5, kind: output, shape index: {}]  }
   0x1   :  { %v300_v0 = vld [vmem:[%s431_s1] sm:$0xff]   ;;  %267 = vmatprep.subr.bf16.mxu0 %v338_v1  ;;  %275 = vmatprep.subr.bf16.mxu1 %v338_v1  ;;  %v301_v2 = vld [vmem:[%s431_s1 + $0x8] sm:$0xff]  }
   0x2   :  { %268 = vmatpush3.bf16.msra.mxu0 %v300_v0  ;;  %271 = vmatprep.mubr.msk.bf16.mxu0 %vm339_vm0, %v338_v1  ;;  %v22_v3 = vld [vmem:[%s430_s0] sm:$0xff]  ;;  %v23_v4 = vld [vmem:[%s430_s0 + $0x8] sm:$0xff] }
   0x3   :  { %269 = vmatprep.subr.bf16.mxu0 %v338_v1  ;;  %291 = vmatprep.mubr.msk.bf16.mxu1 %vm339_vm0, %v338_v1  ;;  %v24_v5 = vpack.c.bf16 %v23_v4, %v22_v3 }
   0x6   :  { %270 = vmatpush3.bf16.msra.mxu0 %v301_v2 }
   0x7   :  { %10 = vsyncpa [#allocation3], 0  ;;  %v302_v6 = vld [vmem:[%s433_s3] sm:$0xff]   ;;  %v303_v7 = vld [vmem:[%s433_s3 + $0x8] sm:$0xff]   ;;  %s340_s17 = smov [#allocation2]  }
   0x8   :  { %276 = vmatpush3.bf16.msra.mxu1 %v302_v6  ;;  %v304_v8 = vld [vmem:[%s433_s3 + $0x10] sm:$0xff]   ;;  %v305_v9 = vld [vmem:[%s433_s3 + $0x18] sm:$0xff]   ;;  %v306_v10 = vld [vmem:[%s433_s3 + $0x20] sm:$0xff]   ;;  %s231_s18 = sshll.u32 %s340_s17, 4  ;;  %s232_s18 = int_to_ptr.vmem [resolvable:$true] %s231_s18 }
   0x9   :  { %272 = vmatmul.mubr.msk.bf16.vlgmr.msra.gmra.mrb[0].mxu0 %vm48_vm1, %v24_v5  ;;  %277 = vmatprep.subr.bf16.mxu1 %v338_v1  ;;  %v307_v11 = vld [vmem:[%s433_s3 + $0x28] sm:$0xff]   ;;  %v308_v12 = vld [vmem:[%s433_s3 + $0x30] sm:$0xff]   ;;  %v309_v13 = vld [vmem:[%s433_s3 + $0x38] sm:$0xff]   ;;  %s314_s19 = scalar_lea.vmem %s232_s18, 256  ;;  %p319_p1 = scmp.lt.s32.totalorder %s232_s18, %s232_s18 }
   0xa   :  { %v242_v14 = vld [vmem:[%s432_s2] ss:$0 sm:$0xff]  ;;  %p315_p0 = scmp.ne.s32.totalorder %s232_s18, %s314_s19  ;;  %p320_p2 = scmp.lt.s32.totalorder %s314_s19, %s314_s19 }
   0xb   :  { %v246_v40 = vld [vmem:[%s434_s4] ss:$0 sm:$0xff] }
   0xc   :  { %278 = vmatpush3.bf16.msra.mxu1 %v303_v7  ;;  %p321_p3 = por %p320_p2, %p319_p1 }
   0xd   :  { %279 = vmatprep.subr.bf16.mxu1 %v338_v1 }
   0xe   :  { %p322_p4 = pnand %p321_p3, %p315_p0 }
  0x10   :  { %280 = vmatpush3.bf16.msra.mxu1 %v304_v8 }
  0x11   :  { %281 = vmatprep.subr.bf16.mxu1 %v338_v1 }
  0x14   :  { %282 = vmatpush3.bf16.msra.mxu1 %v305_v9 }
  0x15   :  { %283 = vmatprep.subr.bf16.mxu1 %v338_v1 }
  0x18   :  { %284 = vmatpush3.bf16.msra.mxu1 %v306_v10 }
  0x19   :  { %285 = vmatprep.subr.bf16.mxu1 %v338_v1 }
  0x1c   :  { %286 = vmatpush3.bf16.msra.mxu1 %v307_v11 }
  0x1d   :  { %287 = vmatprep.subr.bf16.mxu1 %v338_v1 }
  0x20   :  { %288 = vmatpush3.bf16.msra.mxu1 %v308_v12 }
  0x21   :  { %289 = vmatprep.subr.bf16.mxu1 %v338_v1 }
  0x24   :  { %290 = vmatpush3.bf16.msra.mxu1 %v309_v13 }
  0xdc   :  { %v86_v15 = vpop.f32.mrb[0].mxu0 }
  0xdd   :  { %v87_v16 = vadd.f32 %v242_v14, %v86_v15  ;;  %v273_v17 = vpop.f32.mrb[1].mxu0 }
  0xde   :  { %v89_v18 = vpop.f32.mrb[2].mxu0 }
  0xdf   :  { %v93_v19 = vmul.f32 %v87_v16, %v87_v16  ;;  %v90_v20 = vadd.f32 %v242_v14, %v89_v18  ;;  %v274_v21 = vpop.f32.mrb[3].mxu0 }
  0xe1   :  { %v95_v22 = vmul.f32 %v93_v19, %v87_v16  ;;  %v94_v23 = vmul.f32 %v90_v20, %v90_v20 }
  0xe3   :  { %v97_v24 = vmul.f32 0.044715, %v95_v22  ;;  %v96_v25 = vmul.f32 %v94_v23, %v90_v20 }
  0xe5   :  { %v99_v26 = vadd.f32 %v97_v24, %v87_v16  ;;  %v98_v27 = vmul.f32 0.044715, %v96_v25 }
  0xe7   :  { %v101_v28 = vmul.f32 0.7978846, %v99_v26  ;;  %v100_v29 = vadd.f32 %v98_v27, %v90_v20 }
  0xe9   :  { %310 = vtanh.f32 %v101_v28  ;;  %v102_v30 = vmul.f32 0.7978846, %v100_v29 }
  0xeb   :  { %312 = vtanh.f32 %v102_v30 }
  0xf3   :  { %v311_v31 = vpop.eup %310 }
  0xf4   :  { %v105_v32 = vadd.f32 1.0, %v311_v31 }
  0xf5   :  { %v313_v33 = vpop.eup %312 }
  0xf6   :  { %v106_v34 = vadd.f32 1.0, %v313_v33  ;;  %v107_v35 = vmul.f32 0.5, %v105_v32 }
  0xf8   :  { %v108_v36 = vmul.f32 0.5, %v106_v34  ;;  %v109_v37 = vmul.f32 %v107_v35, %v87_v16 }
  0xfa   :  { %v110_v38 = vmul.f32 %v108_v36, %v90_v20 }
  0xfc   :  { %v111_v39 = vpack.c.bf16 %v110_v38, %v109_v37 }
  0xfe   :  { %292 = vmatmul.mubr.bf16.vlgmr.msra.gmra.mrb[0].mxu1 %v111_v39 }
 0x1d1   :  { %v217_v41 = vpop.f32.mrb[0].mxu1 }
 0x1d2   :  { %v218_v42 = vadd.f32 %v246_v40, %v217_v41  ;;  %v293_v43 = vpop.f32.mrb[1].mxu1 }
 0x1d3   :  { %v220_v44 = vpop.f32.mrb[2].mxu1 }
 0x1d4   :  { %224 = vst.msk [vmem:[#allocation2] sm:$0xff] %vm48_vm1, %v218_v42  ;;  %v221_v45 = vadd.f32 %v246_v40, %v220_v44  ;;  %v294_v46 = vpop.f32.mrb[3].mxu1 }
 0x1d6   :  { %225 = vst.msk [vmem:[#allocation2 + $0x8] sm:$0xff] %vm48_vm1, %v221_v45 }
 0x1d7   :  { %325 = shalt.err (!%p322_p4)
}
 0x1d8   :  { %s326_s21 = scalar_lea.hbm %s435_s5, 256 }
 0x1d9   :  { %p327_p5 = scmp.ne.s32.totalorder %s435_s5, %s326_s21  ;;  %p330_p6 = scmp.lt.u32.totalorder %s326_s21, %s435_s5 }
 0x1db   :  { %p332_p7 = pnand %p330_p6, %p327_p5 }
 0x1dd   :  { %335 = shalt.err (!%p332_p7)
}
 0x1de   :  { %s341_s26 = smov 128   ;;  %s342_s1 = smov 8  }
 0x1df   :  { %237 = dma.vmem_to_hbm [thread:$0]  %s232_s18, 256, %s435_s5, [#allocation3], %s341_s26, %s341_s26, %s342_s1  }
 0x1e0   :  { %336 = dma.done.wait [#allocation3], 256  }
 0x1e1   :  { %337 = vsyncadd [#allocation3], 4294967040 }
 0x1e2   :  { %241 = vsyncpa [#allocation3], 1 }

</bundles_post_ra>
